<compile_context>
chip_gen: v5e
topology: v5e:2x2
jax: 0.10.0
libtpu: 0.0.40
codegen_flags: <defaults>
</compile_context>

<pallas_src>
import jax
import jax.numpy as jnp
from jax import lax
from jax.experimental import pallas as pl
from jax.experimental.pallas import tpu as pltpu


def _proj_t_kernel(x_ref, w_ref, b_ref, o_ref):
    # x_ref: (TILE_M, C)      -- streamed token tile
    # w_ref: (out_dim, C)     -- resident (PyTorch nn.Linear weight layout)
    # b_ref: (out_dim, 1)     -- resident
    # o_ref: (out_dim, TILE_M)-- transposed output: token dim on lanes (dense)
    acc = lax.dot_general(
        w_ref[...], x_ref[...],
        dimension_numbers=(((1,), (1,)), ((), ())),   # contract C with C
        preferred_element_type=jnp.float32,
    )                                                 # (out_dim, TILE_M), f32 acc
    o_ref[...] = (acc + b_ref[...]).astype(o_ref.dtype)


def patch_unembed(x, weight, bias, h, w, patch_size, *, tile_m=1024):
    """Pallas implementation of PatchUnEmbed.forward.

    Args:
      x:      (B, L, C) float32, L == h*w
      weight: (out_dim, C) float32   (PyTorch nn.Linear weight layout)
      bias:   (out_dim,)   float32
    Returns:
      (B, out_chans, h*patch_size, w*patch_size) float32 (NCHW)
    """
    B, L, C = x.shape
    assert L == h * w, (L, h, w)
    out_dim = weight.shape[0]
    out_chans = out_dim // (patch_size * patch_size)
    M = B * L

    x_flat = x.reshape(M, C)
    b_col = bias.reshape(out_dim, 1)

    # Tile size: big enough to amortize per-step overhead, small enough that
    # 2x double-buffered (x + out) tiles stay far under the VMEM budget on
    # every generation (v7x has only 64 MiB VMEM).  For small problems use a
    # single full-extent block (always layout-legal).
    if M <= tile_m:
        tile_m = M
    grid = (pl.cdiv(M, tile_m),)

    itemsize = jnp.dtype(x.dtype).itemsize
    cost = pl.CostEstimate(
        flops=2 * M * C * out_dim,
        transcendentals=0,
        bytes_accessed=(M * C + out_dim * C + out_dim + M * out_dim) * itemsize,
    )

    y_t = pl.pallas_call(
        _proj_t_kernel,
        out_shape=jax.ShapeDtypeStruct((out_dim, M), x.dtype),
        grid_spec=pltpu.PrefetchScalarGridSpec(
            num_scalar_prefetch=0,
            grid=grid,
            in_specs=[
                pl.BlockSpec((tile_m, C), lambda i: (i, 0)),    # x: streamed over M
                pl.BlockSpec((out_dim, C), lambda i: (0, 0)),   # W: resident
                pl.BlockSpec((out_dim, 1), lambda i: (0, 0)),   # b: resident
            ],
            out_specs=pl.BlockSpec((out_dim, tile_m), lambda i: (0, i)),
        ),
        compiler_params=pltpu.CompilerParams(
            dimension_semantics=("parallel",),        # shard M across TCs (v7x: 2)
            vmem_limit_bytes=32 * 1024 * 1024,
        ),
        cost_estimate=cost,
    )(x_flat, weight, b_col)

    # Unpatchify to NCHW (matches torch reshape/permute/reshape exactly).
    # TODO(synk): the (ps, ps) sub-lane-sized pixel interleave has no clean
    # lane/sublane-friendly Pallas formulation; this 6-D permute is left to XLA.
    y = y_t.reshape(out_chans, patch_size, patch_size, B, h, w)
    y = jnp.transpose(y, (3, 0, 4, 1, 5, 2))
    return y.reshape(B, out_chans, h * patch_size, w * patch_size)


if __name__ == "__main__":
    # Small, module-consistent shapes.
    patch_size = 4
    out_chans = 3
    embed_dim = 32
    B, h, w = 2, 8, 8
    L = h * w
    out_dim = out_chans * patch_size * patch_size  # 48

    key = jax.random.PRNGKey(0)
    kx, kw, kb = jax.random.split(key, 3)
    x = jax.random.normal(kx, (B, L, embed_dim), dtype=jnp.float32)
    # Deterministic synthetic parameters (nn.Linear(embed_dim, out_dim) shapes).
    weight = jax.random.normal(kw, (out_dim, embed_dim), dtype=jnp.float32) * 0.05
    bias = jax.random.normal(kb, (out_dim,), dtype=jnp.float32) * 0.05

    out = patch_unembed(x, weight, bias, h, w, patch_size)
    out = jax.block_until_ready(out)
    assert out.shape == (B, out_chans, h * patch_size, w * patch_size), out.shape

    # Reference check in plain JAX (same semantics as the PyTorch forward).
    ref = (x @ weight.T + bias).reshape(B, h, w, out_chans, patch_size, patch_size)
    ref = jnp.transpose(ref, (0, 3, 1, 4, 2, 5)).reshape(
        B, out_chans, h * patch_size, w * patch_size
    )
    assert jnp.allclose(out, ref, atol=1e-5, rtol=1e-5)

    print("KERNEL_OK")
</pallas_src>

<mosaic_0001>
module attributes {stable_mosaic.version = 11 : i64} {
  func.func @_proj_t_kernel(%arg0: i32, %arg1: memref<128x32xf32, #tpu.memory_space<vmem>>, %arg2: memref<48x32xf32, #tpu.memory_space<vmem>>, %arg3: memref<48x1xf32, #tpu.memory_space<vmem>>, %arg4: memref<48x128xf32, #tpu.memory_space<vmem>>) attributes {dimension_semantics = [#tpu.dimension_semantics<parallel>], iteration_bounds = array<i64: 1>, scalar_prefetch = 0 : i64, scratch_operands = 0 : i64, tpu.core_type = #tpu.core_type<tc>, window_params = [{transform_indices = @transform_0, window_bounds = array<i64: 128, 32>}, {pipeline_mode = #tpu.pipeline_mode<synchronous>, transform_indices = @transform_1, window_bounds = array<i64: 48, 32>}, {pipeline_mode = #tpu.pipeline_mode<synchronous>, transform_indices = @transform_2, window_bounds = array<i64: 48, 1>}, {transform_indices = @transform_3, window_bounds = array<i64: 48, 128>}]} {
    %c0 = arith.constant 0 : index
    %c0_0 = arith.constant 0 : index
    %0 = vector.load %arg2[%c0, %c0_0] : memref<48x32xf32, #tpu.memory_space<vmem>>, vector<48x32xf32>
    %c0_1 = arith.constant 0 : index
    %c0_2 = arith.constant 0 : index
    %1 = vector.load %arg1[%c0_1, %c0_2] : memref<128x32xf32, #tpu.memory_space<vmem>>, vector<128x32xf32>
    %cst = arith.constant dense<0.000000e+00> : vector<48x128xf32>
    %2 = tpu.matmul %0, %1, %cst {dimension_numbers = #tpu.dot_dimension_numbers<[1], [1], [0], [0], [0, 0, 1, 0], [], []>} : vector<48x32xf32>, vector<128x32xf32>, vector<48x128xf32> -> vector<48x128xf32>
    %c0_3 = arith.constant 0 : index
    %c0_4 = arith.constant 0 : index
    %3 = vector.load %arg3[%c0_3, %c0_4] : memref<48x1xf32, #tpu.memory_space<vmem>>, vector<48x1xf32>
    %4 = vector.broadcast %3 : vector<48x1xf32> to vector<48x128xf32>
    %5 = arith.addf %2, %4 : vector<48x128xf32>
    %c0_5 = arith.constant 0 : index
    %c0_6 = arith.constant 0 : index
    %6 = vector.load %arg4[%c0_5, %c0_6] : memref<48x128xf32, #tpu.memory_space<vmem>>, vector<48x128xf32>
    tpu.vector_store %arg4[%c0_5, %c0_6], %5 {strides = array<i32>} : memref<48x128xf32, #tpu.memory_space<vmem>>, vector<48x128xf32>,
    return
  }
  func.func @transform_0(%arg0: i32) -> (i32, i32) {
    %c0_i32 = arith.constant 0 : i32
    %c0_i32_0 = arith.constant 0 : i32
    return %arg0, %c0_i32 : i32, i32
  }
  func.func @transform_1(%arg0: i32) -> (i32, i32) {
    %c0_i32 = arith.constant 0 : i32
    %c0_i32_0 = arith.constant 0 : i32
    %c0_i32_1 = arith.constant 0 : i32
    return %c0_i32, %c0_i32_0 : i32, i32
  }
  func.func @transform_2(%arg0: i32) -> (i32, i32) {
    %c0_i32 = arith.constant 0 : i32
    %c0_i32_0 = arith.constant 0 : i32
    %c0_i32_1 = arith.constant 0 : i32
    return %c0_i32, %c0_i32_0 : i32, i32
  }
  func.func @transform_3(%arg0: i32) -> (i32, i32) {
    %c0_i32 = arith.constant 0 : i32
    %c0_i32_0 = arith.constant 0 : i32
    return %c0_i32, %arg0 : i32, i32
  }
}

</mosaic_0001>

<bundles_post_ra>
// kernel: tpu_custom_call.1
= control target key start
LH: loop header
LB: loop body
LE: loop exit
PB: predicated region body
PF: predicated region fallthrough
CT: control target
= control target key end

     0   :  { %vm73_vm0 = vcmask 261120   ;;  %s483_s0 = inlined_call_operand.vmem [shape: f32[128,32], index: 0, kind: input, shape index: {}]   ;;  %s484_s1 = inlined_call_operand.vmem [shape: f32[48,32], index: 1, kind: input, shape index: {}]   ;;  %s485_s2 = inlined_call_operand.vmem [shape: f32[48,1], index: 2, kind: input, shape index: {}]   ;;  %s486_s3 = inlined_call_operand.hbm [shape: f32[48,128], index: 3, kind: output, shape index: {}]  }
   0x1   :  { %v36_v0 = vld [vmem:[%s483_s0 + $0x78] sm:$0xff]  ;;  %v35_v1 = vld [vmem:[%s483_s0 + $0x70] sm:$0xff] }
   0x2   :  { %222 = vmatpush.xpose.msk.msra.mxu2 %vm73_vm0, %v36_v0  ;;  %223 = vmatpush.xpose.msk.msra.mxu3 %vm73_vm0, %v36_v0 }
   0x3   :  { %199 = vmatpush.xpose.msk.msra.mxu0 %vm73_vm0, %v36_v0  ;;  %221 = vmatpush.xpose.msk.msra.mxu1 %vm73_vm0, %v36_v0 }
   0x4   :  { %8 = vsyncpa [#allocation3], 0  ;;  %v34_v2 = vld [vmem:[%s483_s0 + $0x68] sm:$0xff]  ;;  %v33_v3 = vld [vmem:[%s483_s0 + $0x60] sm:$0xff]  ;;  %v302_v10 = vmov 0   ;;  %s187_s15 = sshll.u32 %s486_s3, 4  ;;  %s188_s15 = int_to_ptr.hbm [resolvable:$true] %s187_s15 }
   0x5   :  { %v32_v4 = vld [vmem:[%s483_s0 + $0x58] sm:$0xff]  ;;  %v31_v5 = vld [vmem:[%s483_s0 + $0x50] sm:$0xff]  ;;  %v30_v6 = vld [vmem:[%s483_s0 + $0x48] sm:$0xff]  ;;  %274 = vset.pattern.permute.xlu1 %v302_v10  ;;  %273 = vset.pattern.permute.xlu0 %v302_v10  ;;  %s304_s16 = smov 128   ;;  %s305_s17 = smov 8  }
   0x6   :  { %225 = vmatpush.xpose.msk.msra.mxu2 %vm73_vm0, %v35_v1  ;;  %226 = vmatpush.xpose.msk.msra.mxu3 %vm73_vm0, %v35_v1  ;;  %v29_v7 = vld [vmem:[%s483_s0 + $0x40] sm:$0xff]  ;;  %v28_v8 = vld [vmem:[%s483_s0 + $0x38] sm:$0xff]  ;;  %v27_v9 = vld [vmem:[%s483_s0 + $0x30] sm:$0xff] }
   0x7   :  { %200 = vmatpush.xpose.msk.msra.mxu0 %vm73_vm0, %v35_v1  ;;  %224 = vmatpush.xpose.msk.msra.mxu1 %vm73_vm0, %v35_v1  ;;  %v26_v11 = vld [vmem:[%s483_s0 + $0x28] sm:$0xff]  ;;  %v39_v12 = vld [vmem:[%s485_s2 + $0x10] sm:$0xff]  ;;  %v37_v13 = vld [vmem:[%s485_s2] sm:$0xff] }
   0x8   :  { %275 = vset.pattern.permute.xlu2 %v302_v10  ;;  %v41_v14 = vld [vmem:[%s485_s2 + $0x20] sm:$0xff]  ;;  %55 = vperm.xlu1 %274, %v39_v12   ;;  %v24_v16 = vld [vmem:[%s483_s0 + $0x18] sm:$0xff]  ;;  %v38_v18 = vld [vmem:[%s485_s2 + $0x8] sm:$0xff] }
   0x9   :  { %v25_v15 = vld [vmem:[%s483_s0 + $0x20] sm:$0xff]  ;;  %45 = vperm.xlu0 %273, %v37_v13   ;;  %65 = vperm.xlu2 %275, %v41_v14   ;;  %v40_v17 = vld [vmem:[%s485_s2 + $0x18] sm:$0xff]  ;;  %v42_v19 = vld [vmem:[%s485_s2 + $0x28] sm:$0xff] }
   0xa   :  { %228 = vmatpush.xpose.msk.msra.mxu2 %vm73_vm0, %v34_v2  ;;  %229 = vmatpush.xpose.msk.msra.mxu3 %vm73_vm0, %v34_v2  ;;  %v23_v20 = vld [vmem:[%s483_s0 + $0x10] sm:$0xff]  ;;  %v22_v21 = vld [vmem:[%s483_s0 + $0x8] sm:$0xff]  ;;  %v21_v22 = vld [vmem:[%s483_s0] sm:$0xff] }
   0xb   :  { %201 = vmatpush.xpose.msk.msra.mxu0 %vm73_vm0, %v34_v2  ;;  %227 = vmatpush.xpose.msk.msra.mxu1 %vm73_vm0, %v34_v2  ;;  %v17_v23 = vld [vmem:[%s484_s1 + $0x10] sm:$0xff]  ;;  %v19_v24 = vld [vmem:[%s484_s1 + $0x20] sm:$0xff]  ;;  %v16_v26 = vld [vmem:[%s484_s1 + $0x8] sm:$0xff] }
   0xc   :  { %v15_v25 = vld [vmem:[%s484_s1] sm:$0xff]  ;;  %v18_v27 = vld [vmem:[%s484_s1 + $0x18] sm:$0xff]  ;;  %v20_v28 = vld [vmem:[%s484_s1 + $0x28] sm:$0xff]  ;;  %s303_s1 = smov [#allocation2]  }
   0xd   :  { %s185_s12 = sshll.u32 %s303_s1, 4  ;;  %s186_s12 = int_to_ptr.vmem [resolvable:$true] %s185_s12 }
   0xe   :  { %231 = vmatpush.xpose.msk.msra.mxu2 %vm73_vm0, %v33_v3  ;;  %232 = vmatpush.xpose.msk.msra.mxu3 %vm73_vm0, %v33_v3 }
   0xf   :  { %202 = vmatpush.xpose.msk.msra.mxu0 %vm73_vm0, %v33_v3  ;;  %230 = vmatpush.xpose.msk.msra.mxu1 %vm73_vm0, %v33_v3 }
  0x10   :  { %60 = vperm.xlu1 %274, %v40_v17  }
  0x11   :  { %50 = vperm.xlu0 %273, %v38_v18   ;;  %70 = vperm.xlu2 %275, %v42_v19  }
  0x12   :  { %234 = vmatpush.xpose.msk.msra.mxu2 %vm73_vm0, %v32_v4  ;;  %235 = vmatpush.xpose.msk.msra.mxu3 %vm73_vm0, %v32_v4 }
  0x13   :  { %203 = vmatpush.xpose.msk.msra.mxu0 %vm73_vm0, %v32_v4  ;;  %233 = vmatpush.xpose.msk.msra.mxu1 %vm73_vm0, %v32_v4 }
  0x16   :  { %237 = vmatpush.xpose.msk.msra.mxu2 %vm73_vm0, %v31_v5  ;;  %238 = vmatpush.xpose.msk.msra.mxu3 %vm73_vm0, %v31_v5 }
  0x17   :  { %204 = vmatpush.xpose.msk.msra.mxu0 %vm73_vm0, %v31_v5  ;;  %236 = vmatpush.xpose.msk.msra.mxu1 %vm73_vm0, %v31_v5 }
  0x1a   :  { %240 = vmatpush.xpose.msk.msra.mxu2 %vm73_vm0, %v30_v6  ;;  %241 = vmatpush.xpose.msk.msra.mxu3 %vm73_vm0, %v30_v6 }
  0x1b   :  { %205 = vmatpush.xpose.msk.msra.mxu0 %vm73_vm0, %v30_v6  ;;  %239 = vmatpush.xpose.msk.msra.mxu1 %vm73_vm0, %v30_v6 }
  0x1e   :  { %243 = vmatpush.xpose.msk.msra.mxu2 %vm73_vm0, %v29_v7  ;;  %244 = vmatpush.xpose.msk.msra.mxu3 %vm73_vm0, %v29_v7 }
  0x1f   :  { %206 = vmatpush.xpose.msk.msra.mxu0 %vm73_vm0, %v29_v7  ;;  %242 = vmatpush.xpose.msk.msra.mxu1 %vm73_vm0, %v29_v7 }
  0x22   :  { %246 = vmatpush.xpose.msk.msra.mxu2 %vm73_vm0, %v28_v8  ;;  %247 = vmatpush.xpose.msk.msra.mxu3 %vm73_vm0, %v28_v8 }
  0x23   :  { %207 = vmatpush.xpose.msk.msra.mxu0 %vm73_vm0, %v28_v8  ;;  %245 = vmatpush.xpose.msk.msra.mxu1 %vm73_vm0, %v28_v8 }
  0x26   :  { %249 = vmatpush.xpose.msk.msra.mxu2 %vm73_vm0, %v27_v9  ;;  %250 = vmatpush.xpose.msk.msra.mxu3 %vm73_vm0, %v27_v9 }
  0x27   :  { %208 = vmatpush.xpose.msk.msra.mxu0 %vm73_vm0, %v27_v9  ;;  %248 = vmatpush.xpose.msk.msra.mxu1 %vm73_vm0, %v27_v9 }
  0x2a   :  { %252 = vmatpush.xpose.msk.msra.mxu2 %vm73_vm0, %v26_v11  ;;  %253 = vmatpush.xpose.msk.msra.mxu3 %vm73_vm0, %v26_v11 }
  0x2b   :  { %209 = vmatpush.xpose.msk.msra.mxu0 %vm73_vm0, %v26_v11  ;;  %251 = vmatpush.xpose.msk.msra.mxu1 %vm73_vm0, %v26_v11 }
  0x2e   :  { %255 = vmatpush.xpose.msk.msra.mxu2 %vm73_vm0, %v25_v15  ;;  %256 = vmatpush.xpose.msk.msra.mxu3 %vm73_vm0, %v25_v15 }
  0x2f   :  { %210 = vmatpush.xpose.msk.msra.mxu0 %vm73_vm0, %v25_v15  ;;  %254 = vmatpush.xpose.msk.msra.mxu1 %vm73_vm0, %v25_v15 }
  0x32   :  { %258 = vmatpush.xpose.msk.msra.mxu2 %vm73_vm0, %v24_v16  ;;  %259 = vmatpush.xpose.msk.msra.mxu3 %vm73_vm0, %v24_v16 }
  0x33   :  { %211 = vmatpush.xpose.msk.msra.mxu0 %vm73_vm0, %v24_v16  ;;  %257 = vmatpush.xpose.msk.msra.mxu1 %vm73_vm0, %v24_v16 }
  0x36   :  { %261 = vmatpush.xpose.msk.msra.mxu2 %vm73_vm0, %v23_v20  ;;  %262 = vmatpush.xpose.msk.msra.mxu3 %vm73_vm0, %v23_v20 }
  0x37   :  { %212 = vmatpush.xpose.msk.msra.mxu0 %vm73_vm0, %v23_v20  ;;  %260 = vmatpush.xpose.msk.msra.mxu1 %vm73_vm0, %v23_v20 }
  0x3a   :  { %264 = vmatpush.xpose.msk.msra.mxu2 %vm73_vm0, %v22_v21  ;;  %265 = vmatpush.xpose.msk.msra.mxu3 %vm73_vm0, %v22_v21 }
  0x3b   :  { %213 = vmatpush.xpose.msk.msra.mxu0 %vm73_vm0, %v22_v21  ;;  %263 = vmatpush.xpose.msk.msra.mxu1 %vm73_vm0, %v22_v21 }
  0x3e   :  { %267 = vmatpush.xpose.msk.msra.mxu2 %vm73_vm0, %v21_v22  ;;  %268 = vmatpush.xpose.msk.msra.mxu3 %vm73_vm0, %v21_v22 }
  0x3f   :  { %214 = vmatpush.xpose.msk.msra.mxu0 %vm73_vm0, %v21_v22  ;;  %266 = vmatpush.xpose.msk.msra.mxu1 %vm73_vm0, %v21_v22 }
  0x41   :  { %217 = vmatmul.msk.f32.vlgmr.msra.gmra.mxu2 %vm73_vm0, %v17_v23  ;;  %219 = vmatmul.msk.f32.vlgmr.msra.gmra.mxu3 %vm73_vm0, %v19_v24 }
  0x42   :  { %215 = vmatmul.msk.f32.vlgmr.msra.gmra.mxu0 %vm73_vm0, %v15_v25  ;;  %216 = vmatmul.msk.f32.vlgmr.msra.gmra.mxu1 %vm73_vm0, %v16_v26 }
  0x49   :  { %218 = vmatmul.msk.f32.gmra.mxu2 %vm73_vm0, %v18_v27  ;;  %220 = vmatmul.msk.f32.gmra.mxu3 %vm73_vm0, %v20_v28 }
  0x63   :  { %v66_v35 = vpop.permute.xlu2 %65 }
  0x6b   :  { %v71_v41 = vpop.permute.xlu2 %70 }
  0x7a   :  { %v56_v36 = vpop.permute.xlu1 %55 }
  0x7b   :  { %v46_v29 = vpop.permute.xlu0 %45 }
  0x82   :  { %v61_v42 = vpop.permute.xlu1 %60 }
  0x83   :  { %v51_v30 = vpop.permute.xlu0 %50 }
  0xbf   :  { %v157_v31 = vpop.f32.mrf.mxu0  ;;  %v160_v32 = vpop.f32.mrf.mxu1 }
  0xc0   :  { %v158_v33 = vadd.f32 %v157_v31, %v46_v29  ;;  %v161_v34 = vadd.f32 %v160_v32, %v51_v30 }
  0xc2   :  { %175 = vst [vmem:[#allocation2] sm:$0xff] %v158_v33 }
  0xc3   :  { %176 = vst [vmem:[#allocation2 + $0x8] sm:$0xff] %v161_v34 }
  0xc4   :  { %v163_v37 = vpop.f32.mrf.mxu2  ;;  %v169_v38 = vpop.f32.mrf.mxu3 }
  0xc5   :  { %v164_v39 = vadd.f32 %v163_v37, %v56_v36  ;;  %v170_v40 = vadd.f32 %v169_v38, %v66_v35 }
  0xc7   :  { %177 = vst [vmem:[#allocation2 + $0x10] sm:$0xff] %v164_v39 }
  0xc8   :  { %179 = vst [vmem:[#allocation2 + $0x20] sm:$0xff] %v170_v40 }
  0xcc   :  { %v166_v43 = vpop.f32.mrf.mxu2  ;;  %v172_v44 = vpop.f32.mrf.mxu3 }
  0xcd   :  { %v167_v45 = vadd.f32 %v166_v43, %v61_v42  ;;  %v173_v46 = vadd.f32 %v172_v44, %v71_v41 }
  0xcf   :  { %178 = vst [vmem:[#allocation2 + $0x18] sm:$0xff] %v167_v45 }
  0xd0   :  { %180 = vst [vmem:[#allocation2 + $0x28] sm:$0xff] %v173_v46 }
  0xd1   :  { %193 = dma.vmem_to_hbm [thread:$0]  %s186_s12, 768, %s188_s15, [#allocation3], %s304_s16, %s304_s16, %s305_s17  }
  0xd2   :  { %300 = dma.done.wait [#allocation3], 768  }
  0xd3   :  { %301 = vsyncadd [#allocation3], 4294966528 }
  0xd4   :  { %198 = vsyncpa [#allocation3], 1 }

</bundles_post_ra>
